<compile_context>
chip_gen: v7x
topology: tpu7x:2x2x1
jax: 0.10.0
libtpu: 0.0.40
codegen_flags: <defaults>
</compile_context>

<pallas_src>
import functools
import math

import jax
import jax.numpy as jnp
from jax.experimental import pallas as pl
from jax.experimental.pallas import tpu as pltpu


def _round_up(x, m):
    return ((x + m - 1) // m) * m


# ----------------------------------------------------------------------------
# Fused kernel: KD (batchmean KL) + per-parameter L2 norms + final combine.
# ----------------------------------------------------------------------------
def _fused_kd_l2_kernel(
    pid_ref,       # SMEM int32[grid]  : param id per grid step (scalar prefetch)
    s_ref,         # VMEM (TB, C)      : student logits block
    t_ref,         # VMEM (TB, C)      : teacher logits block
    p_ref,         # VMEM (PR, 128)    : packed params block
    op_ref,        # VMEM (PR, 128)    : packed old-params block
    out_ref,       # SMEM (1,) f32     : scalar total loss
    kl_acc_ref,    # VMEM (1, C)  f32  : per-class KL accumulator (lane-dense)
    ssq_acc_ref,   # VMEM (1, NP) f32  : per-param sum-of-squares accumulator
    *,
    n_kd_blocks,
    n_total_blocks,
    inv_temperature,
    inv_batch,
    lambda_reg,
):
    i = pl.program_id(0)

    @pl.when(i == 0)
    def _init():
        kl_acc_ref[...] = jnp.zeros_like(kl_acc_ref)
        ssq_acc_ref[...] = jnp.zeros_like(ssq_acc_ref)

    # ---------------- KD partial: one batch block ----------------
    @pl.when(i < n_kd_blocks)
    def _kd():
        s = s_ref[...].astype(jnp.float32) * inv_temperature
        t = t_ref[...].astype(jnp.float32) * inv_temperature

        # student log-softmax along the class (lane) axis
        s_sh = s - jnp.max(s, axis=1, keepdims=True)
        log_s_sum = jnp.log(jnp.sum(jnp.exp(s_sh), axis=1, keepdims=True))

        # teacher softmax + log-softmax; reciprocal goes to the EUP slot
        t_sh = t - jnp.max(t, axis=1, keepdims=True)
        t_exp = jnp.exp(t_sh)
        t_sum = jnp.sum(t_exp, axis=1, keepdims=True)
        log_t_sum = jnp.log(t_sum)
        q = t_exp * pl.reciprocal(t_sum, approx=True)

        # q * (log q - log p). Zero-padded batch rows contribute exactly 0.
        kl_elem = q * ((t_sh - log_t_sum) - (s_sh - log_s_sum))
        # sublane (batch) reduce -> lane-dense (1, C) accumulator
        kl_acc_ref[...] += jnp.sum(kl_elem, axis=0, keepdims=True)

    # ---------------- L2 partial: one packed-parameter block ----------------
    @pl.when(i >= n_kd_blocks)
    def _l2():
        d = p_ref[...].astype(jnp.float32) - op_ref[...].astype(jnp.float32)
        blk_ssq = jnp.sum(d * d)                      # zero padding adds 0
        pid = pid_ref[i]
        lane = jax.lax.broadcasted_iota(jnp.int32, ssq_acc_ref.shape, 1)
        ssq_acc_ref[...] += jnp.where(lane == pid, blk_ssq, 0.0)

    # ---------------- finalize ----------------
    @pl.when(i == n_total_blocks - 1)
    def _finalize():
        kl = jnp.sum(kl_acc_ref[...]) * inv_batch
        l2 = jnp.sum(jnp.sqrt(ssq_acc_ref[...]))      # sqrt(0)=0 for unused lanes
        out_ref[0] = kl + lambda_reg * l2


# ----------------------------------------------------------------------------
# Pack all parameters into one lane-dense (rows, 128) slab, each parameter
# zero-padded up to a whole number of (PR, 128) blocks.
# ----------------------------------------------------------------------------
def _pack_params(params, old_params, rows_per_block):
    blk_elems = rows_per_block * 128
    p_parts, op_parts, pids = [], [], []
    for idx, (p, op) in enumerate(zip(params, old_params)):
        pf = jnp.ravel(p).astype(jnp.float32)
        opf = jnp.ravel(op).astype(jnp.float32)
        n = pf.shape[0]
        if n == 0:
            continue
        nb = max(1, math.ceil(n / blk_elems))
        pad = nb * blk_elems - n
        if pad:
            pf = jnp.pad(pf, (0, pad))
            opf = jnp.pad(opf, (0, pad))
        p_parts.append(pf)
        op_parts.append(opf)
        pids.extend([idx] * nb)
    if not p_parts:
        return None
    p_slab = jnp.concatenate(p_parts).reshape(-1, 128)
    op_slab = jnp.concatenate(op_parts).reshape(-1, 128)
    return p_slab, op_slab, pids, len(params)


# ----------------------------------------------------------------------------
# Module-equivalent wrapper (single fused pallas_call).
# ----------------------------------------------------------------------------
def knowledge_distillation_loss_with_regularization(
    outputs,
    teacher_outputs,
    l2,
    model_params,
    old_model_params,
    *,
    temperature,
    lambda_reg,
    kd_rows_per_block=512,        # batch rows per KD block (clamped by VMEM budget)
    param_rows_per_block=128,     # (rows, 128) per packed-parameter block
    vmem_limit_bytes=32 * 1024 * 1024,   # safe on v5e/v6e/v7x; raise on v6e/v5e
):
    lambda_reg = float(lambda_reg) if lambda_reg else 0.0
    b, c = outputs.shape

    # ---- KD tiling: batch is padded with zero rows (contribute exactly 0) ----
    bytes_per_row = c * 4
    # 2 f32 logit inputs x 2 pipeline buffers = 4 f32 copies per batch row
    tb_cap = max(8, ((vmem_limit_bytes // 2) // (bytes_per_row * 4)) // 8 * 8)
    tb = min(_round_up(b, 8), _round_up(kd_rows_per_block, 8), tb_cap)
    b_pad = _round_up(b, tb)
    if b_pad != b:
        outputs = jnp.pad(outputs, ((0, b_pad - b), (0, 0)))
        teacher_outputs = jnp.pad(teacher_outputs, ((0, b_pad - b), (0, 0)))
    n_kd = b_pad // tb

    # ---- L2 packing: all params into one lane-dense slab ----
    pr = int(param_rows_per_block)
    packed = None
    if l2 and len(model_params) > 0:
        packed = _pack_params(model_params, old_model_params, pr)
    if packed is None:
        # dummy all-zero slab -> contributes exactly 0 to the L2 term
        p_slab = jnp.zeros((pr, 128), jnp.float32)
        op_slab = p_slab
        pids, n_params = [0], 1
    else:
        p_slab, op_slab, pids, n_params = packed

    n_p_blocks = p_slab.shape[0] // pr
    n_total = n_kd + n_p_blocks
    np_lanes = _round_up(max(n_params, 1), 128)

    # per-grid-step param id (entries for KD steps are unused)
    pid_arr = jnp.asarray([0] * n_kd + pids, dtype=jnp.int32)

    kernel = functools.partial(
        _fused_kd_l2_kernel,
        n_kd_blocks=n_kd,
        n_total_blocks=n_total,
        inv_temperature=1.0 / float(temperature),
        inv_batch=1.0 / float(b),
        lambda_reg=lambda_reg,
    )

    grid_spec = pltpu.PrefetchScalarGridSpec(
        num_scalar_prefetch=1,
        grid=(n_total,),
        in_specs=[
            # logits stay pinned on their last block during the param phase
            # (same block index -> no re-DMA)
            pl.BlockSpec((tb, c), lambda i, pid: (jnp.minimum(i, n_kd - 1), 0)),
            pl.BlockSpec((tb, c), lambda i, pid: (jnp.minimum(i, n_kd - 1), 0)),
            # param slab stays pinned on block 0 during the KD phase
            pl.BlockSpec((pr, 128), lambda i, pid: (jnp.maximum(i - n_kd, 0), 0)),
            pl.BlockSpec((pr, 128), lambda i, pid: (jnp.maximum(i - n_kd, 0), 0)),
        ],
        out_specs=pl.BlockSpec(memory_space=pltpu.MemorySpace.SMEM),
        scratch_shapes=[
            pltpu.VMEM((1, c), jnp.float32),         # per-class KL accumulator
            pltpu.VMEM((1, np_lanes), jnp.float32),  # per-param sum-of-squares
        ],
    )

    out = pl.pallas_call(
        kernel,
        out_shape=jax.ShapeDtypeStruct((1,), jnp.float32),
        grid_spec=grid_spec,
        compiler_params=pltpu.CompilerParams(
            dimension_semantics=("arbitrary",),   # sequential accumulation
            vmem_limit_bytes=vmem_limit_bytes,
        ),
    )(pid_arr, outputs, teacher_outputs, p_slab, op_slab)
    return out[0]


if __name__ == "__main__":
    key = jax.random.PRNGKey(0)
    k1, k2, k3, k4, k5, k6 = jax.random.split(key, 6)

    B, C = 8, 32            # student/teacher logits: (batch, classes)
    outputs = jax.random.normal(k1, (B, C), dtype=jnp.float32)
    teacher_outputs = jax.random.normal(k2, (B, C), dtype=jnp.float32)

    # Deterministic synthetic "model" / "old_model" parameters (a weight & bias)
    W = jax.random.normal(k3, (16, 32), dtype=jnp.float32) * 0.1
    bvec = jax.random.normal(k4, (32,), dtype=jnp.float32) * 0.1
    W_old = W + 0.01 * jax.random.normal(k5, (16, 32), dtype=jnp.float32)
    b_old = bvec + 0.01 * jax.random.normal(k6, (32,), dtype=jnp.float32)
    model_params = [W, bvec]
    old_model_params = [W_old, b_old]

    temperature = 2.0
    lambda_reg = 0.5

    loss_total = knowledge_distillation_loss_with_regularization(
        outputs,
        teacher_outputs,
        l2=True,
        model_params=model_params,
        old_model_params=old_model_params,
        temperature=temperature,
        lambda_reg=lambda_reg,
    )
    loss_total = jax.block_until_ready(loss_total)

    # Pure-JAX reference (softmax over dim=1, KLDiv batchmean)
    log_p = jax.nn.log_softmax(outputs / temperature, axis=1)
    log_q = jax.nn.log_softmax(teacher_outputs / temperature, axis=1)
    q = jnp.exp(log_q)
    kl = jnp.sum(q * (log_q - log_p)) / B
    l2r = sum(
        jnp.sqrt(jnp.sum((p - op) ** 2))
        for p, op in zip(model_params, old_model_params)
    )
    ref = kl + lambda_reg * l2r

    # tolerance accounts for the EUP approximate reciprocal used for the
    # teacher softmax normalization (pl.reciprocal(..., approx=True))
    assert jnp.allclose(loss_total, ref, rtol=5e-3, atol=5e-3), (loss_total, ref)
    print("KERNEL_OK")
</pallas_src>

<mosaic_0001>
module attributes {stable_mosaic.version = 11 : i64} {
  func.func @_fused_kd_l2_kernel(%arg0: i32, %arg1: memref<3xi32, #tpu.memory_space<smem>>, %arg2: memref<8x32xf32, #tpu.memory_space<vmem>>, %arg3: memref<8x32xf32, #tpu.memory_space<vmem>>, %arg4: memref<128x128xf32, #tpu.memory_space<vmem>>, %arg5: memref<128x128xf32, #tpu.memory_space<vmem>>, %arg6: memref<1xf32, #tpu.memory_space<smem>>, %arg7: memref<1x32xf32, #tpu.memory_space<vmem>>, %arg8: memref<1x128xf32, #tpu.memory_space<vmem>>) attributes {dimension_semantics = [#tpu.dimension_semantics<arbitrary>], iteration_bounds = array<i64: 3>, scalar_prefetch = 1 : i64, scratch_operands = 2 : i64, tpu.core_type = #tpu.core_type<tc>, window_params = [{transform_indices = @transform_0, window_bounds = array<i64: 8, 32>}, {transform_indices = @transform_1, window_bounds = array<i64: 8, 32>}, {transform_indices = @transform_2, window_bounds = array<i64: 128, 128>}, {transform_indices = @transform_3, window_bounds = array<i64: 128, 128>}, {transform_indices = @transform_4, window_bounds = array<i64: 1>}]} {
    %c0_i32 = arith.constant 0 : i32
    %0 = arith.cmpi eq, %arg0, %c0_i32 : i32
    %1 = arith.extui %0 : i1 to i32
    %c0_i32_0 = arith.constant 0 : i32
    %2 = arith.cmpi ne, %1, %c0_i32_0 : i32
    scf.if %2 {
      %cst = arith.constant 0.000000e+00 : f32
      %12 = vector.broadcast %cst : f32 to vector<1x32xf32>
      %c0 = arith.constant 0 : index
      %c0_5 = arith.constant 0 : index
      %13 = vector.load %arg7[%c0, %c0_5] : memref<1x32xf32, #tpu.memory_space<vmem>>, vector<1x32xf32>
      tpu.vector_store %arg7[%c0, %c0_5], %12 {strides = array<i32>} : memref<1x32xf32, #tpu.memory_space<vmem>>, vector<1x32xf32>,
      %cst_6 = arith.constant 0.000000e+00 : f32
      %14 = vector.broadcast %cst_6 : f32 to vector<1x128xf32>
      %c0_7 = arith.constant 0 : index
      %c0_8 = arith.constant 0 : index
      %15 = vector.load %arg8[%c0_7, %c0_8] : memref<1x128xf32, #tpu.memory_space<vmem>>, vector<1x128xf32>
      tpu.vector_store %arg8[%c0_7, %c0_8], %14 {strides = array<i32>} : memref<1x128xf32, #tpu.memory_space<vmem>>, vector<1x128xf32>,
    } else {
    }
    %c1_i32 = arith.constant 1 : i32
    %3 = arith.cmpi slt, %arg0, %c1_i32 : i32
    %4 = arith.extui %3 : i1 to i32
    %c0_i32_1 = arith.constant 0 : i32
    %5 = arith.cmpi ne, %4, %c0_i32_1 : i32
    scf.if %5 {
      %c0 = arith.constant 0 : index
      %c0_5 = arith.constant 0 : index
      %12 = vector.load %arg2[%c0, %c0_5] : memref<8x32xf32, #tpu.memory_space<vmem>>, vector<8x32xf32>
      %cst = arith.constant 5.000000e-01 : f32
      %13 = vector.broadcast %cst : f32 to vector<8x32xf32>
      %14 = arith.mulf %12, %13 : vector<8x32xf32>
      %c0_6 = arith.constant 0 : index
      %c0_7 = arith.constant 0 : index
      %15 = vector.load %arg3[%c0_6, %c0_7] : memref<8x32xf32, #tpu.memory_space<vmem>>, vector<8x32xf32>
      %cst_8 = arith.constant 5.000000e-01 : f32
      %16 = vector.broadcast %cst_8 : f32 to vector<8x32xf32>
      %17 = arith.mulf %15, %16 : vector<8x32xf32>
      %cst_9 = arith.constant dense<0xFF800000> : vector<8xf32>
      %18 = vector.multi_reduction <maximumf>, %14, %cst_9 [1] : vector<8x32xf32> to vector<8xf32>
      %19 = vector.shape_cast %18 : vector<8xf32> to vector<8x1xf32>
      %20 = vector.broadcast %19 : vector<8x1xf32> to vector<8x32xf32>
      %21 = arith.subf %14, %20 : vector<8x32xf32>
      %22 = math.exp %21 : vector<8x32xf32>
      %cst_10 = arith.constant dense<0.000000e+00> : vector<8xf32>
      %23 = vector.multi_reduction <add>, %22, %cst_10 [1] : vector<8x32xf32> to vector<8xf32>
      %24 = vector.shape_cast %23 : vector<8xf32> to vector<8x1xf32>
      %25 = math.log %24 : vector<8x1xf32>
      %cst_11 = arith.constant dense<0xFF800000> : vector<8xf32>
      %26 = vector.multi_reduction <maximumf>, %17, %cst_11 [1] : vector<8x32xf32> to vector<8xf32>
      %27 = vector.shape_cast %26 : vector<8xf32> to vector<8x1xf32>
      %28 = vector.broadcast %27 : vector<8x1xf32> to vector<8x32xf32>
      %29 = arith.subf %17, %28 : vector<8x32xf32>
      %30 = math.exp %29 : vector<8x32xf32>
      %cst_12 = arith.constant dense<0.000000e+00> : vector<8xf32>
      %31 = vector.multi_reduction <add>, %30, %cst_12 [1] : vector<8x32xf32> to vector<8xf32>
      %32 = vector.shape_cast %31 : vector<8xf32> to vector<8x1xf32>
      %33 = math.log %32 : vector<8x1xf32>
      %34 = tpu.reciprocal %32 {approx = true} : vector<8x1xf32> -> vector<8x1xf32>
      %35 = vector.broadcast %34 : vector<8x1xf32> to vector<8x32xf32>
      %36 = arith.mulf %30, %35 : vector<8x32xf32>
      %37 = vector.broadcast %33 : vector<8x1xf32> to vector<8x32xf32>
      %38 = arith.subf %29, %37 : vector<8x32xf32>
      %39 = vector.broadcast %25 : vector<8x1xf32> to vector<8x32xf32>
      %40 = arith.subf %21, %39 : vector<8x32xf32>
      %41 = arith.subf %38, %40 : vector<8x32xf32>
      %42 = arith.mulf %36, %41 : vector<8x32xf32>
      %c0_13 = arith.constant 0 : index
      %c0_14 = arith.constant 0 : index
      %43 = vector.load %arg7[%c0_13, %c0_14] : memref<1x32xf32, #tpu.memory_space<vmem>>, vector<1x32xf32>
      %cst_15 = arith.constant dense<0.000000e+00> : vector<32xf32>
      %44 = vector.multi_reduction <add>, %42, %cst_15 [0] : vector<8x32xf32> to vector<32xf32>
      %45 = vector.shape_cast %44 : vector<32xf32> to vector<1x32xf32>
      %46 = arith.addf %43, %45 : vector<1x32xf32>
      %c0_16 = arith.constant 0 : index
      %c0_17 = arith.constant 0 : index
      %47 = vector.load %arg7[%c0_16, %c0_17] : memref<1x32xf32, #tpu.memory_space<vmem>>, vector<1x32xf32>
      tpu.vector_store %arg7[%c0_16, %c0_17], %46 {strides = array<i32>} : memref<1x32xf32, #tpu.memory_space<vmem>>, vector<1x32xf32>,
    } else {
    }
    %c1_i32_2 = arith.constant 1 : i32
    %6 = arith.cmpi sge, %arg0, %c1_i32_2 : i32
    %7 = arith.extui %6 : i1 to i32
    %c0_i32_3 = arith.constant 0 : i32
    %8 = arith.cmpi ne, %7, %c0_i32_3 : i32
    scf.if %8 {
      %c0 = arith.constant 0 : index
      %c0_5 = arith.constant 0 : index
      %12 = vector.load %arg4[%c0, %c0_5] : memref<128x128xf32, #tpu.memory_space<vmem>>, vector<128x128xf32>
      %c0_6 = arith.constant 0 : index
      %c0_7 = arith.constant 0 : index
      %13 = vector.load %arg5[%c0_6, %c0_7] : memref<128x128xf32, #tpu.memory_space<vmem>>, vector<128x128xf32>
      %14 = arith.subf %12, %13 : vector<128x128xf32>
      %15 = arith.mulf %14, %14 : vector<128x128xf32>
      %16 = vector.shape_cast %15 : vector<128x128xf32> to vector<1x128x128xf32>
      %cst = arith.constant dense<0.000000e+00> : vector<1xf32>
      %17 = vector.multi_reduction <add>, %16, %cst [1, 2] : vector<1x128x128xf32> to vector<1xf32>
      %18 = vector.shape_cast %17 : vector<1xf32> to vector<1x1x1xf32>
      %19 = vector.extract %18[0, 0, 0] : f32 from vector<1x1x1xf32>
      %20 = arith.index_cast %arg0 : i32 to index
      %21 = memref.load %arg1[%20] : memref<3xi32, #tpu.memory_space<smem>>
      %22 = tpu.iota {dimensions = array<i32: 1>} : vector<1x128xi32>
      %c0_8 = arith.constant 0 : index
      %c0_9 = arith.constant 0 : index
      %23 = vector.load %arg8[%c0_8, %c0_9] : memref<1x128xf32, #tpu.memory_space<vmem>>, vector<1x128xf32>
      %24 = vector.broadcast %21 : i32 to vector<1x128xi32>
      %25 = arith.cmpi eq, %22, %24 : vector<1x128xi32>
      %cst_10 = arith.constant 0.000000e+00 : f32
      %26 = vector.broadcast %19 : f32 to vector<1x128xf32>
      %27 = vector.broadcast %cst_10 : f32 to vector<1x128xf32>
      %28 = arith.select %25, %26, %27 : vector<1x128xi1>, vector<1x128xf32>
      %29 = arith.addf %23, %28 : vector<1x128xf32>
      %c0_11 = arith.constant 0 : index
      %c0_12 = arith.constant 0 : index
      %30 = vector.load %arg8[%c0_11, %c0_12] : memref<1x128xf32, #tpu.memory_space<vmem>>, vector<1x128xf32>
      tpu.vector_store %arg8[%c0_11, %c0_12], %29 {strides = array<i32>} : memref<1x128xf32, #tpu.memory_space<vmem>>, vector<1x128xf32>,
    } else {
    }
    %c2_i32 = arith.constant 2 : i32
    %9 = arith.cmpi eq, %arg0, %c2_i32 : i32
    %10 = arith.extui %9 : i1 to i32
    %c0_i32_4 = arith.constant 0 : i32
    %11 = arith.cmpi ne, %10, %c0_i32_4 : i32
    scf.if %11 {
      %c0 = arith.constant 0 : index
      %c0_5 = arith.constant 0 : index
      %12 = vector.load %arg7[%c0, %c0_5] : memref<1x32xf32, #tpu.memory_space<vmem>>, vector<1x32xf32>
      %13 = vector.shape_cast %12 : vector<1x32xf32> to vector<1x1x32xf32>
      %cst = arith.constant dense<0.000000e+00> : vector<1xf32>
      %14 = vector.multi_reduction <add>, %13, %cst [1, 2] : vector<1x1x32xf32> to vector<1xf32>
      %15 = vector.shape_cast %14 : vector<1xf32> to vector<1x1x1xf32>
      %16 = vector.extract %15[0, 0, 0] : f32 from vector<1x1x1xf32>
      %cst_6 = arith.constant 1.250000e-01 : f32
      %17 = arith.mulf %16, %cst_6 : f32
      %c0_7 = arith.constant 0 : index
      %c0_8 = arith.constant 0 : index
      %18 = vector.load %arg8[%c0_7, %c0_8] : memref<1x128xf32, #tpu.memory_space<vmem>>, vector<1x128xf32>
      %19 = math.sqrt %18 : vector<1x128xf32>
      %20 = vector.shape_cast %19 : vector<1x128xf32> to vector<1x1x128xf32>
      %cst_9 = arith.constant dense<0.000000e+00> : vector<1xf32>
      %21 = vector.multi_reduction <add>, %20, %cst_9 [1, 2] : vector<1x1x128xf32> to vector<1xf32>
      %22 = vector.shape_cast %21 : vector<1xf32> to vector<1x1x1xf32>
      %23 = vector.extract %22[0, 0, 0] : f32 from vector<1x1x1xf32>
      %cst_10 = arith.constant 5.000000e-01 : f32
      %24 = arith.mulf %cst_10, %23 : f32
      %25 = arith.addf %17, %24 : f32
      %c0_11 = arith.constant 0 : index
      %26 = memref.load %arg6[%c0_11] : memref<1xf32, #tpu.memory_space<smem>>
      memref.store %25, %arg6[%c0_11] : memref<1xf32, #tpu.memory_space<smem>>
    } else {
    }
    return
  }
  func.func @transform_0(%arg0: i32, %arg1: memref<3xi32, #tpu.memory_space<smem>>) -> (i32, i32) {
    %c0_i32 = arith.constant 0 : i32
    %0 = arith.minsi %arg0, %c0_i32 : i32
    %c0_i32_0 = arith.constant 0 : i32
    %c0_i32_1 = arith.constant 0 : i32
    return %0, %c0_i32_0 : i32, i32
  }
  func.func @transform_1(%arg0: i32, %arg1: memref<3xi32, #tpu.memory_space<smem>>) -> (i32, i32) {
    %c0_i32 = arith.constant 0 : i32
    %0 = arith.minsi %arg0, %c0_i32 : i32
    %c0_i32_0 = arith.constant 0 : i32
    %c0_i32_1 = arith.constant 0 : i32
    return %0, %c0_i32_0 : i32, i32
  }
  func.func @transform_2(%arg0: i32, %arg1: memref<3xi32, #tpu.memory_space<smem>>) -> (i32, i32) {
    %c1_i32 = arith.constant 1 : i32
    %0 = arith.subi %arg0, %c1_i32 : i32
    %c0_i32 = arith.constant 0 : i32
    %1 = arith.maxsi %0, %c0_i32 : i32
    %c0_i32_0 = arith.constant 0 : i32
    %c0_i32_1 = arith.constant 0 : i32
    return %1, %c0_i32_0 : i32, i32
  }
  func.func @transform_3(%arg0: i32, %arg1: memref<3xi32, #tpu.memory_space<smem>>) -> (i32, i32) {
    %c1_i32 = arith.constant 1 : i32
    %0 = arith.subi %arg0, %c1_i32 : i32
    %c0_i32 = arith.constant 0 : i32
    %1 = arith.maxsi %0, %c0_i32 : i32
    %c0_i32_0 = arith.constant 0 : i32
    %c0_i32_1 = arith.constant 0 : i32
    return %1, %c0_i32_0 : i32, i32
  }
  func.func @transform_4(%arg0: i32, %arg1: memref<3xi32, #tpu.memory_space<smem>>) -> i32 {
    %c0_i32 = arith.constant 0 : i32
    %c0_i32_0 = arith.constant 0 : i32
    return %c0_i32 : i32
  }
}

</mosaic_0001>

<bundles_post_ra>
// kernel: tpu_custom_call.1
= control target key start
LH: loop header
LB: loop body
LE: loop exit
PB: predicated region body
PF: predicated region fallthrough
CT: control target
= control target key end

     0   :  { %s1474_s0 = inlined_call_operand.hbm [shape: s32[3], index: 0, kind: input, shape index: {}]   ;;  %s1475_s1 = inlined_call_operand.hbm [shape: f32[8,32], index: 1, kind: input, shape index: {}]   ;;  %s1476_s2 = inlined_call_operand.hbm [shape: f32[8,32], index: 2, kind: input, shape index: {}]   ;;  %s1477_s3 = inlined_call_operand.hbm [shape: f32[256,128], index: 3, kind: input, shape index: {}]   ;;  %s1478_s4 = inlined_call_operand.hbm [shape: f32[256,128], index: 4, kind: input, shape index: {}]   ;;  %s1479_s5 = inlined_call_operand.hbm [shape: f32[1], index: 5, kind: output, shape index: {}]  }
   0x1   :  { %1483 = sst [smem:[#allocation21_spill]] %s1475_s1  ;;  %s822_s20 = scalar_lea.hbm %s1474_s0, 16 }
   0x2   :  { %1484 = sst [smem:[#allocation22_spill]] %s1476_s2  ;;  %p823_p0 = scmp.ne.s32.totalorder %s1474_s0, %s822_s20 }
   0x3   :  { %p826_p1 = scmp.lt.u32.totalorder %s822_s20, %s1474_s0 }
   0x5   :  { %p828_p2 = pnand %p826_p1, %p823_p0 }
   0x7   :  { %831 = shalt.err (!%p828_p2)  }
   0x8   :  { %s1042_s25 = smov [#allocation5]  }
   0x9   :  { %11 = dma.hbm_to_smem %s1474_s0, 16, %s1042_s25, [#allocation4] }
   0xa   :  { %992 = dma.done.wait [#allocation4], 16 }
   0xb   :  { %993 = vsyncadd [#allocation4], 4294967280 }
   0xc   :  { %13 = sfence }
   0xd   :  { %14 = vsyncpa [#allocation7], 0 }
   0xe   :  { %16 = vsyncpa [#allocation7 + $0x1], 0 }
   0xf   :  { %17 = vsyncpa [#allocation10], 0 }
  0x10   :  { %19 = vsyncpa [#allocation10 + $0x1], 0 }
  0x11   :  { %20 = vsyncpa [#allocation13], 0 }
  0x12   :  { %22 = vsyncpa [#allocation13 + $0x1], 0 }
  0x13   :  { %23 = vsyncpa [#allocation8], 0  ;;  %s1093_s28 = smov 0   ;;  %s1095_s29 = smov 0  }
  0x14   :  { %s1097_s30 = smov 0   ;;  %s1099_s6 = smov 0  }
  0x15   :  { %s1101_s7 = smov 0   ;;  %s1103_s0 = smov 0  }
  0x16   :  { %s1105_s8 = smov 0  }
  0x17 LB: > { %s1127_s9 = sadd.s32 4294967295, %s1040_s8   ;;  %s1130_s10 = sadd.s32 1, %s1040_s8   ;;  %s1040_s8 = sphi %s1105_s8, %s1505_s8   ;;  %s1036_s0 = sphi %s1103_s0, %s1504_s0   ;;  %s1032_s7 = sphi %s1101_s7, %s1503_s7   ;;  %s1028_s6 = sphi %s1099_s6, %s1502_s6   ;;  %s1024_s30 = sphi %s1097_s30, %s1501_s30   ;;  %s1020_s29 = sphi %s1095_s29, %s1500_s29   ;;  %s1016_s28 = sphi %s1093_s28, %s1499_s28  }
  0x18   : > { %p33_p3 = scmp.lt.s32.totalorder %s1040_s8, 0  ;;  %p35_p4 = scmp.lt.s32.totalorder %s1130_s10, 0 }
  0x19   : > { %s40_s11 = sadd.s32 1, %s1036_s0  ;;  %p47_p5 = scmp.ne.s32.totalorder %s1036_s0, %s1032_s7 }
  0x1a   : > { %s1138_s12 = scalar_select %p33_p3, %s1040_s8, 0 }
  0x1b   : > { %s36_s13 = scalar_select %p35_p4, %s1130_s10, 0 }
  0x1c   : > { %p48_p6 = scmp.eq.s32.totalorder %s1040_s8, 0  ;;  %p53_p7 = scmp.ne.s32.totalorder %s1032_s7, %s1028_s6 }
  0x1d   : > { %s37_s14 = ssub.s32 %s1138_s12, %s36_s13  ;;  %p54_p8 = scmp.eq.s32.totalorder %s1127_s9, 0 }
  0x1e   : > { %p38_p9 = scmp.eq.s32.totalorder %s37_s14, 0  ;;  %p1147_p10 = por %p48_p6, %p47_p5 }
  0x1f   : > { %p1151_p11 = por %p54_p8, %p53_p7  ;;  %s683_s17 = sadd.s32 4294967295, %s1130_s10 }
  0x20   : > { %s1157_s18 = scalar_select %p38_p9, %s1036_s0, %s40_s11  }
  0x21   : > { %s1486_s16 = scalar_select %p1151_p11, 1, 0 }
  0x22   : > { %p97_p12 = scmp.gt.s32.totalorder %s683_s17, 0  ;;  %p109_p13 = scmp.ne.s32.totalorder %s1024_s30, %s1020_s29 }
  0x23   : > { %p115_p0 = scmp.ne.s32.totalorder %s1020_s29, %s1016_s28  ;;  %p746_p3 = scmp.lt.s32.totalorder %s1040_s8, 3 }
  0x24   : > { %s1507_s17 = smov (!%p97_p12, %s683_s17), 0  ;;  %p111_p1 = por %p109_p13, %p48_p6 }
  0x25   : > { %p1168_p2 = por %p115_p0, %p54_p8  ;;  %s1480_s21 = sand.u32 1, %s1036_s0  }
  0x26   : > { %s689_s22 = sshll.u32 %s1138_s12, 7  ;;  %s1177_s23 = sshll.u32 %s1480_s21, 3 }
  0x27   : > { %s1487_s20 = scalar_select %p1168_p2, 1, 0 }
  0x28   : > { %p1181_p4 = pnand %p746_p3, %p1147_p10  ;;  %s212_s25 = sand.u32 1, %s1040_s8  }
  0x29   : > { %s1489_s2 = sld [smem:[#allocation22_spill]]  ;;  %s216_s6 = scalar_lea.vmem [#allocation9], %s1177_s23 }
  0x2a   : > { %s225_s11 = sshll.u32 %s216_s6, 4  ;;  %p1196_p5 = pnand %p746_p3, %p111_p1  ;;  %s1194_s11 = int_to_ptr.vmem [resolvable:$true] %s225_s11 }
  0x2b   : > { %s1200_s14 = scalar_lea.sflag [#allocation10], %s212_s25  ;;  %p834_p7 = pneg %p1181_p4 }
  0x2f   : > { %s1191_s28 = scalar_lea.hbm %s1489_s2, %s689_s22  ;;  %s837_s6 = scalar_lea.hbm %s1489_s2, 128 }
  0x30   : > { %s832_s15 = scalar_lea.hbm %s1191_s28, 128  ;;  %p838_p10 = scmp.lt.u32.totalorder %s1191_s28, %s1489_s2 }
  0x31   : > { %p833_p6 = scmp.ne.s32.totalorder %s1191_s28, %s832_s15  ;;  %p839_p12 = scmp.lt.u32.totalorder %s837_s6, %s832_s15 }
  0x32   : > { %p841_p0 = scmp.lt.u32.totalorder %s832_s15, %s1191_s28 }
  0x33   : > { %p835_p8 = pnand %p834_p7, %p833_p6  ;;  %p840_p13 = por %p839_p12, %p838_p10 }
  0x35   : > { %p836_p9 = pneg %p835_p8  ;;  %p842_p1 = por %p841_p0, %p840_p13 }
  0x37   : > { %p843_p3 = pnand %p842_p1, %p836_p9 }
  0x39   : > { %846 = shalt.err (!%p843_p3)
}
  0x3a   : > { %s847_s25 = scalar_lea.vmem %s1194_s11, 128  ;;  %s1043_s26 = smov [#allocation9]  }
  0x3b   : > { %p848_p6 = scmp.ne.s32.totalorder %s1194_s11, %s847_s25  ;;  %s852_s27 = sshll.u32 %s1043_s26, 4  ;;  %s853_s27 = int_to_ptr.vmem [resolvable:$false] %s852_s27 }
  0x3c   : > { %s854_s19 = scalar_lea.vmem %s853_s27, 256  ;;  %p855_p11 = scmp.lt.s32.totalorder %s1194_s11, %s853_s27 }
  0x3d   : > { %p850_p8 = pnand %p848_p6, %p834_p7  ;;  %p856_p10 = scmp.lt.s32.totalorder %s854_s19, %s847_s25 }
  0x3f   : > { %p851_p2 = pneg %p850_p8  ;;  %p857_p12 = por %p856_p10, %p855_p11 }
  0x41   : > { %p858_p13 = pnand %p857_p12, %p851_p2 }
  0x43   : > { %861 = shalt.err (!%p858_p13)
}
  0x44   : > { %739 = dma.hbm_to_vmem [thread:$0]  (!%p1181_p4), %s1191_s28, 128, %s1194_s11, %s1200_s14  }
  0x45   : > { %p700_p9 = scmp.ge.s32.totalorder %s1040_s8, 1  ;;  %p278_p0 = scmp.lt.s32.totalorder %s1040_s8, 4 }
  0x46   : > { %s1491_s1 = sld [smem:[#allocation21_spill]]  ;;  %s196_s26 = scalar_lea.vmem [#allocation6], %s1177_s23 }
  0x47   : > { %p1237_p11 = pnand %p700_p9, %p278_p0  ;;  %s205_s27 = sshll.u32 %s196_s26, 4  ;;  %s1242_s27 = int_to_ptr.vmem [resolvable:$true] %s205_s27 }
  0x48   : > { %s1493_s8 = sand.u32 1, %s1036_s0  }
  0x49   : > { %s1492_s25 = scalar_select %p1237_p11, 1, 0 }
  0x4a   : > { %s193_s12 = scalar_lea.sflag [#allocation7], %s1493_s8 }
  0x4c   : > { %s1235_s6 = scalar_lea.hbm %s1491_s1, %s689_s22  ;;  %s867_s19 = scalar_lea.hbm %s1491_s1, 128 }
  0x4d   : > { %s862_s28 = scalar_lea.hbm %s1235_s6, 128  ;;  %p868_p8 = scmp.lt.u32.totalorder %s1235_s6, %s1491_s1 }
  0x4e   : > { %p863_p1 = scmp.ne.s32.totalorder %s1235_s6, %s862_s28  ;;  %p869_p10 = scmp.lt.u32.totalorder %s867_s19, %s862_s28 }
  0x4f   : > { %p871_p13 = scmp.lt.u32.totalorder %s862_s28, %s1235_s6 }
  0x50   : > { %p865_p3 = pnand %p863_p1, %p834_p7  ;;  %p870_p12 = por %p869_p10, %p868_p8 }
  0x52   : > { %p866_p6 = pneg %p865_p3  ;;  %p872_p9 = por %p871_p13, %p870_p12 }
  0x54   : > { %p873_p0 = pnand %p872_p9, %p866_p6 }
  0x56   : > { %876 = shalt.err (!%p873_p0)
}
  0x57   : > { %s877_s23 = scalar_lea.vmem %s1242_s27, 128  ;;  %s1044_s26 = smov [#allocation6]  }
  0x58   : > { %p878_p1 = scmp.ne.s32.totalorder %s1242_s27, %s877_s23  ;;  %s882_s8 = sshll.u32 %s1044_s26, 4  ;;  %s883_s8 = int_to_ptr.vmem [resolvable:$false] %s882_s8 }
  0x59   : > { %s884_s22 = scalar_lea.vmem %s883_s8, 256  ;;  %p885_p11 = scmp.lt.s32.totalorder %s1242_s27, %s883_s8 }
  0x5a   : > { %p880_p3 = pnand %p878_p1, %p834_p7  ;;  %p886_p8 = scmp.lt.s32.totalorder %s884_s22, %s877_s23 }
  0x5c   : > { %p881_p2 = pneg %p880_p3  ;;  %p887_p10 = por %p886_p8, %p885_p11 }
  0x5e   : > { %p888_p12 = pnand %p887_p10, %p881_p2 }
  0x60   : > { %891 = shalt.err (!%p888_p12)
}
  0x61   : > { %736 = dma.hbm_to_vmem [thread:$0]  (!%p1181_p4), %s1235_s6, 128, %s1242_s27, %s193_s12  }
  0x62   : > { %p1494_p7 = scmp.gt.s32.totalorder %s1127_s9, 0  ;;  %s234_s11 = sand.u32 1, %s1024_s30  }
  0x63   : > { %s1280_s19 = sshll.u32 %s234_s11, 7  ;;  %s1495_s26 = sadd.s32 1, %s1024_s30 }
  0x64   : > { %s1273_s28 = scalar_select %p1494_p7, %s1127_s9, 0 }
  0x65   : > { %s236_s15 = scalar_lea.vmem [#allocation11], %s1280_s19  ;;  %p894_p2 = pneg %p1196_p5 }
  0x66   : > { %s99_s24 = ssub.s32 %s1273_s28, %s1507_s17  ;;  %s713_s21 = sshll.u32 %s1273_s28, 11 }
  0x67   : > { %p100_p11 = scmp.eq.s32.totalorder %s99_s24, 0  ;;  %s246_s23 = sshll.u32 %s236_s15, 4  ;;  %s1296_s23 = int_to_ptr.vmem [resolvable:$true] %s246_s23 }
  0x68   : > { %s1294_s12 = scalar_lea.hbm %s1477_s3, %s713_s21  ;;  %s897_s15 = scalar_lea.hbm %s1477_s3, 4096 }
  0x69   : > { %s1287_s8 = scalar_select %p100_p11, %s1024_s30, %s1495_s26  }
  0x6a   : > { %s892_s17 = scalar_lea.hbm %s1294_s12, 2048  ;;  %p898_p9 = scmp.lt.u32.totalorder %s1294_s12, %s1477_s3 }
  0x6b   : > { %p893_p4 = scmp.ne.s32.totalorder %s1294_s12, %s892_s17  ;;  %p899_p0 = scmp.lt.u32.totalorder %s897_s15, %s892_s17 }
  0x6c   : > { %p901_p3 = scmp.lt.u32.totalorder %s892_s17, %s1294_s12 }
  0x6d   : > { %p895_p6 = pnand %p894_p2, %p893_p4  ;;  %p900_p1 = por %p899_p0, %p898_p9 }
  0x6f   : > { %p896_p13 = pneg %p895_p6  ;;  %p902_p8 = por %p901_p3, %p900_p1 }
  0x71   : > { %p903_p10 = pnand %p902_p8, %p896_p13 }
  0x73   : > { %906 = shalt.err (!%p903_p10)
}
  0x74   : > { %s907_s27 = scalar_lea.vmem %s1296_s23, 2048  ;;  %s1045_s22 = smov [#allocation11]  }
  0x75   : > { %p908_p12 = scmp.ne.s32.totalorder %s1296_s23, %s907_s27  ;;  %s912_s24 = sshll.u32 %s1045_s22, 4  ;;  %s913_s24 = int_to_ptr.vmem [resolvable:$false] %s912_s24 }
  0x76   : > { %s914_s26 = scalar_lea.vmem %s913_s24, 4096  ;;  %p915_p4 = scmp.lt.s32.totalorder %s1296_s23, %s913_s24 }
  0x77   : > { %p910_p7 = pnand %p908_p12, %p894_p2  ;;  %p916_p6 = scmp.lt.s32.totalorder %s914_s26, %s907_s27 }
  0x79   : > { %p911_p11 = pneg %p910_p7  ;;  %p917_p9 = por %p916_p6, %p915_p4 }
  0x7b   : > { %p918_p0 = pnand %p917_p9, %p911_p11 }
  0x7d   : > { %921 = shalt.err (!%p918_p0)
}
  0x7e   : > { %s1046_s17 = smov 128   ;;  %s1047_s15 = smov 8  }
  0x7f   : > { %742 = dma.hbm_to_vmem [thread:$0]  (!%p1196_p5), %s1294_s12, 2048, %s1296_s23, %s1200_s14, %s1046_s17, %s1046_s17, %s1047_s15  }
  0x80   : > { %s1332_s22 = scalar_lea.hbm %s1478_s4, %s713_s21  ;;  %s260_s24 = scalar_lea.vmem [#allocation12], %s1280_s19 }
  0x81   : > { %s270_s26 = sshll.u32 %s260_s24, 4  ;;  %s1339_s1 = scalar_lea.sflag [#allocation13], %s234_s11  ;;  %s1335_s26 = int_to_ptr.vmem [resolvable:$true] %s270_s26 }
  0x82   : > { %s922_s2 = scalar_lea.hbm %s1332_s22, 2048  ;;  %s927_s21 = scalar_lea.hbm %s1478_s4, 4096 }
  0x83   : > { %p923_p13 = scmp.ne.s32.totalorder %s1332_s22, %s922_s2  ;;  %p928_p8 = scmp.lt.u32.totalorder %s1332_s22, %s1478_s4 }
  0x84   : > { %p929_p10 = scmp.lt.u32.totalorder %s927_s21, %s922_s2  ;;  %p931_p7 = scmp.lt.u32.totalorder %s922_s2, %s1332_s22 }
  0x85   : > { %p925_p1 = pnand %p923_p13, %p894_p2 }
  0x86   : > { %p930_p12 = por %p929_p10, %p928_p8 }
  0x87   : > { %p926_p3 = pneg %p925_p1 }
  0x88   : > { %p932_p11 = por %p931_p7, %p930_p12 }
  0x8a   : > { %p933_p4 = pnand %p932_p11, %p926_p3 }
  0x8c   : > { %936 = shalt.err (!%p933_p4)
}
  0x8d   : > { %s937_s11 = scalar_lea.vmem %s1335_s26, 2048  ;;  %s1048_s19 = smov [#allocation12]  }
  0x8e   : > { %p938_p6 = scmp.ne.s32.totalorder %s1335_s26, %s937_s11  ;;  %s942_s6 = sshll.u32 %s1048_s19, 4  ;;  %s943_s6 = int_to_ptr.vmem [resolvable:$false] %s942_s6 }
  0x8f   : > { %s944_s27 = scalar_lea.vmem %s943_s6, 4096  ;;  %p945_p13 = scmp.lt.s32.totalorder %s1335_s26, %s943_s6 }
  0x90   : > { %p940_p9 = pnand %p938_p6, %p894_p2  ;;  %p946_p1 = scmp.lt.s32.totalorder %s944_s27, %s937_s11 }
  0x92   : > { %p941_p0 = pneg %p940_p9  ;;  %p947_p8 = por %p946_p1, %p945_p13 }
  0x94   : > { %p948_p10 = pnand %p947_p8, %p941_p0 }
  0x96   : > { %951 = shalt.err (!%p948_p10)
}
  0x97   : > { %745 = dma.hbm_to_vmem [thread:$0]  (!%p1196_p5), %s1332_s22, 2048, %s1335_s26, %s1339_s1, %s1046_s17, %s1046_s17, %s1047_s15  }
  0x98   : > { %p1496_p2 = scmp.ne.s32.totalorder %s1492_s25, 0 }
  0x99   : > { %s284_s2 = sand.u32 (!%p1496_p2), 1, %s1032_s7   ;;  %p1497_p3 = scmp.ne.s32.totalorder (!%p1496_p2), %s1486_s16, 0 }
  0x9a   : > { %282 = sbr.rel (%p1496_p2) target bundleno = 1017 (0x3f9), region = 36  ;;  %s1371_s24 = sshll.u32 (!%p1496_p2), %s284_s2, 3 }
  0x9b   : > { %s285_s14 = scalar_lea.sflag (!%p1496_p2), [#allocation7], %s284_s2  ;;  %s288_s28 = scalar_lea.vmem (!%p1496_p2), [#allocation6], %s1371_s24 }
  0xa1   : > { %995 = dma.done.wait (%p1497_p3), %s285_s14, 128  }
  0xa2   : > { %997 = vsyncadd (%p1497_p3), %s285_s14, 4294967168  ;;  %s293_s1 = sand.u32 1, %s1127_s9   ;;  %s297_s25 = scalar_lea.vmem [#allocation9], %s1371_s24 }
  0xa3   : > { %s294_s13 = scalar_lea.sflag [#allocation10], %s293_s1 }
  0xa4   : > { %999 = dma.done.wait (%p1497_p3), %s294_s13, 128  }
  0xa5   : > { %1001 = vsyncadd (%p1497_p3), %s294_s13, 4294967168  ;;  %s304_s17 = sand.u32 1, %s1020_s29   ;;  %p1498_p5 = scmp.ne.s32.totalorder %s1487_s20, 0 }
  0xa6   : > { %s703_s15 = sshll.u32 %s304_s17, 7 }
  0xa7   : > { %s1385_s22 = scalar_lea.vmem [#allocation11], %s703_s15 }
  0xa8   : > { %1003 = dma.done.wait (%p1498_p5), %s294_s13, 2048  }
  0xa9   : > { %1005 = vsyncadd (%p1498_p5), %s294_s13, 4294965248  ;;  %s312_s26 = scalar_lea.sflag [#allocation13], %s304_s17  ;;  %s1391_s21 = scalar_lea.vmem [#allocation12], %s703_s15 }
  0xaa   : > { %1007 = dma.done.wait (%p1498_p5), %s312_s26, 2048  }
  0xab   : > { %1009 = vsyncadd (%p1498_p5), %s312_s26, 4294965248  ;;  %p705_p12 = scmp.ne.s32.totalorder %s1127_s9, 0 }
  0xac   : > { %vm366_vm0 = vcmask (!%p705_p12), 253952   ;;  %v1049_v0 = vmov (!%p705_p12), 0.0  }
  0xad   : > { %365 = sbr.rel (%p705_p12) target bundleno = 180 (0xb4), region = 56  ;;  %367 = vst.msk [vmem:[#allocation2] sm:$0x1] (!%p705_p12), %vm366_vm0, %v1049_v0  ;;  %368 = vst [vmem:[#allocation3] sm:$0x1] (!%p705_p12), %v1049_v0 }
  0xb4 PF: > { %p706_p7 = scmp.ge.s32.totalorder %s1127_s9, 1 }
  0xb5   : > { %v373_v1 = vld [vmem:[%s288_s28] sm:$0xff] (!%p706_p7)  ;;  %vm377_vm1 = vcmask (!%p706_p7), 261120   ;;  %v375_v2 = vld [vmem:[%s297_s25] sm:$0xff] (!%p706_p7)  ;;  %vm415_vm2 = vcmask (!%p706_p7), 253952  }
  0xb6   : > { %372 = sbr.rel (%p706_p7) target bundleno = 524 (0x20c), region = 60  ;;  %v374_v3 = vmul.f32 (!%p706_p7), 0.5, %v373_v1  ;;  %v376_v4 = vmul.f32 (!%p706_p7), 0.5, %v375_v2  ;;  %v406_v35 = vld [vmem:[#allocation2] sm:$0x1] (!%p706_p7) }
  0xb8   : > { %v378_v5 = vsel (!%p706_p7), %vm377_vm1, %v374_v3, -inf  ;;  %v389_v6 = vsel (!%p706_p7), %vm377_vm1, %v376_v4, -inf }
  0xb9   : > { %379 = vmax.xlane.f32.xlu0 (!%p706_p7), %v378_v5 }
  0xbd   : > { %390 = vmax.xlane.f32.xlu0 %v389_v6 }
 0x146   : > { %v380_v7 = vpop.xlane.xlu0 %379 }
 0x147   : > { %v381_v8 = vsub.f32 %v374_v3, %v380_v7 }
 0x149   : > { %v382_v9 = vmul.f32 1.442695, %v381_v8 }
 0x14a   : > { %v391_v10 = vpop.xlane.xlu0 %390 }
 0x14b   : > { %810 = vpow2.f32 %v382_v9  ;;  %v392_v11 = vsub.f32 %v376_v4, %v391_v10 }
 0x14d   : > { %v393_v12 = vmul.f32 1.442695, %v392_v11 }
 0x14f   : > { %812 = vpow2.f32 %v393_v12 }
 0x155   : > { %v811_v13 = vpop.eup %810 }
 0x156   : > { %v384_v14 = vsel %vm377_vm1, %v811_v13, 0.0 }
 0x157   : > { %385 = vadd.xlane.f32.xlu1 %v384_v14 }
 0x159   : > { %v813_v15 = vpop.eup %812 }
 0x15a   : > { %v395_v16 = vsel %vm377_vm1, %v813_v15, 0.0 }
 0x15b   : > { %396 = vadd.xlane.f32.xlu1 %v395_v16 }
 0x1e4   : > { %v386_v17 = vpop.xlane.xlu1 %385 }
 0x1e5   : > { %814 = vlog2.f32 %v386_v17 }
 0x1e8   : > { %v397_v18 = vpop.xlane.xlu1 %396 }
 0x1e9   : > { %816 = vlog2.f32 %v397_v18 }
 0x1ea   : > { %818 = vrcp.f32 %v397_v18 }
 0x1ef   : > { %v815_v19 = vpop.eup %814 }
 0x1f0   : > { %v388_v20 = vmul.f32 0.6931472, %v815_v19 }
 0x1f2   : > { %v403_v24 = vsub.f32 %v381_v8, %v388_v20 }
 0x1f3   : > { %v817_v21 = vpop.eup %816 }
 0x1f4   : > { %v399_v22 = vmul.f32 0.6931472, %v817_v21  ;;  %v819_v23 = vpop.eup %818 }
 0x1f5   : > { %v401_v26 = vmul.f32 %v819_v23, %v813_v15 }
 0x1f6   : > { %v402_v25 = vsub.f32 %v392_v11, %v399_v22 }
 0x1f8   : > { %v404_v27 = vsub.f32 %v402_v25, %v403_v24 }
 0x1fa   : > { %v405_v28 = vmul.f32 %v404_v27, %v401_v26 }
 0x1fc   : > { %v407_v29 = vsel %vm377_vm1, %v405_v28, 0.0 }
 0x1fd   : > { %v408_v30 = vrot.slane %v407_v29, 4 }
 0x1ff   : > { %v409_v31 = vadd.f32 %v408_v30, %v407_v29 }
 0x201   : > { %v410_v32 = vrot.slane %v409_v31, 2 }
 0x203   : > { %v411_v33 = vadd.f32 %v410_v32, %v409_v31 }
 0x205   : > { %v412_v34 = vrot.slane %v411_v33, 1 }
 0x207   : > { %v413_v36 = vadd.f32 %v412_v34, %v411_v33 }
 0x209   : > { %v414_v37 = vadd.f32 %v413_v36, %v406_v35 }
 0x20b   : > { %416 = vst.msk [vmem:[#allocation2] sm:$0x1] %vm415_vm2, %v414_v37 }
 0x20c PF: > { %p707_p11 = scmp.lt.s32.totalorder %s1127_s9, 1 }
 0x20d   : > { %v421_v38 = vld [vmem:[%s1385_s22] sm:$0xff] (!%p707_p11)  ;;  %v422_v39 = vld [vmem:[%s1385_s22 + $0x8] sm:$0xff] (!%p707_p11)  ;;  %v423_v40 = vld [vmem:[%s1385_s22 + $0x10] sm:$0xff] (!%p707_p11)  ;;  %s509_s16 = sld [smem:[#allocation5 + %s1127_s9]] (!%p707_p11) }
 0x20e   : > { %420 = sbr.rel (%p707_p11) target bundleno = 770 (0x302), region = 64  ;;  %v437_v41 = vld [vmem:[%s1391_s21] sm:$0xff] (!%p707_p11)  ;;  %v438_v42 = vld [vmem:[%s1391_s21 + $0x8] sm:$0xff] (!%p707_p11)  ;;  %v439_v43 = vld [vmem:[%s1391_s21 + $0x10] sm:$0xff] (!%p707_p11) }
 0x20f   : > { %v453_v44 = vsub.f32 (!%p707_p11), %v421_v38, %v437_v41  ;;  %v454_v45 = vsub.f32 (!%p707_p11), %v422_v39, %v438_v42  ;;  %v424_v46 = vld [vmem:[%s1385_s22 + $0x18] sm:$0xff] (!%p707_p11)  ;;  %v455_v48 = vsub.f32 (!%p707_p11), %v423_v40, %v439_v43  ;;  %v425_v49 = vld [vmem:[%s1385_s22 + $0x20] sm:$0xff] (!%p707_p11)  ;;  %v426_v54 = vld [vmem:[%s1385_s22 + $0x28] sm:$0xff] (!%p707_p11) }
 0x210   : > { %v440_v47 = vld [vmem:[%s1391_s21 + $0x18] sm:$0xff] (!%p707_p11)  ;;  %v441_v50 = vld [vmem:[%s1391_s21 + $0x20] sm:$0xff] (!%p707_p11)  ;;  %v442_v55 = vld [vmem:[%s1391_s21 + $0x28] sm:$0xff] (!%p707_p11) }
 0x211   : > { %v456_v51 = vsub.f32 (!%p707_p11), %v424_v46, %v440_v47  ;;  %v469_v52 = vmul.f32 (!%p707_p11), %v453_v44, %v453_v44  ;;  %v470_v53 = vmul.f32 (!%p707_p11), %v454_v45, %v454_v45  ;;  %v457_v56 = vsub.f32 (!%p707_p11), %v425_v49, %v441_v50  ;;  %v427_v58 = vld [vmem:[%s1385_s22 + $0x30] sm:$0xff] (!%p707_p11)  ;;  %v428_v63 = vld [vmem:[%s1385_s22 + $0x38] sm:$0xff] (!%p707_p11)  ;;  %v429_v4 = vld [vmem:[%s1385_s22 + $0x40] sm:$0xff] (!%p707_p11) }
 0x212   : > { %v471_v57 = vmul.f32 (!%p707_p11), %v455_v48, %v455_v48  ;;  %v443_v59 = vld [vmem:[%s1391_s21 + $0x30] sm:$0xff] (!%p707_p11)  ;;  %v458_v60 = vsub.f32 (!%p707_p11), %v426_v54, %v442_v55  ;;  %v444_v0 = vld [vmem:[%s1391_s21 + $0x38] sm:$0xff] (!%p707_p11)  ;;  %v445_v5 = vld [vmem:[%s1391_s21 + $0x40] sm:$0xff] (!%p707_p11) }
 0x213   : > { %v472_v61 = vmul.f32 (!%p707_p11), %v456_v51, %v456_v51  ;;  %v485_v62 = vadd.f32 (!%p707_p11), %v470_v53, %v469_v52  ;;  %v459_v1 = vsub.f32 (!%p707_p11), %v427_v58, %v443_v59  ;;  %v473_v2 = vmul.f32 (!%p707_p11), %v457_v56, %v457_v56  ;;  %v430_v9 = vld [vmem:[%s1385_s22 + $0x48] sm:$0xff] (!%p707_p11)  ;;  %v431_v14 = vld [vmem:[%s1385_s22 + $0x50] sm:$0xff] (!%p707_p11)  ;;  %v432_v19 = vld [vmem:[%s1385_s22 + $0x58] sm:$0xff] (!%p707_p11) }
 0x214   : > { %v460_v6 = vsub.f32 (!%p707_p11), %v428_v63, %v444_v0  ;;  %v474_v7 = vmul.f32 (!%p707_p11), %v458_v60, %v458_v60  ;;  %v446_v10 = vld [vmem:[%s1391_s21 + $0x48] sm:$0xff] (!%p707_p11)  ;;  %v461_v11 = vsub.f32 (!%p707_p11), %v429_v4, %v445_v5  ;;  %v447_v15 = vld [vmem:[%s1391_s21 + $0x50] sm:$0xff] (!%p707_p11)  ;;  %v448_v20 = vld [vmem:[%s1391_s21 + $0x58] sm:$0xff] (!%p707_p11)  ;;  %v510_v60 = vlaneseq (!%p707_p11) }
 0x215   : > { %v486_v3 = vadd.f32 %v485_v62, %v471_v57  ;;  %v475_v12 = vmul.f32 %v459_v1, %v459_v1  ;;  %v462_v16 = vsub.f32 %v430_v9, %v446_v10  ;;  %v463_v21 = vsub.f32 %v431_v14, %v447_v15  ;;  %v433_v24 = vld [vmem:[%s1385_s22 + $0x60] sm:$0xff]  ;;  %v434_v29 = vld [vmem:[%s1385_s22 + $0x68] sm:$0xff]  ;;  %v435_v34 = vld [vmem:[%s1385_s22 + $0x70] sm:$0xff] }
 0x216   : > { %v476_v17 = vmul.f32 %v460_v6, %v460_v6  ;;  %v477_v22 = vmul.f32 %v461_v11, %v461_v11  ;;  %v449_v25 = vld [vmem:[%s1391_s21 + $0x60] sm:$0xff]  ;;  %v464_v26 = vsub.f32 %v432_v19, %v448_v20  ;;  %v450_v30 = vld [vmem:[%s1391_s21 + $0x68] sm:$0xff]  ;;  %v451_v35 = vld [vmem:[%s1391_s21 + $0x70] sm:$0xff]  ;;  %v513_v62 = vstv %s509_s16 }
 0x217   : > { %v487_v8 = vadd.f32 %v486_v3, %v472_v61  ;;  %v478_v27 = vmul.f32 %v462_v16, %v462_v16  ;;  %v465_v31 = vsub.f32 %v433_v24, %v449_v25  ;;  %v479_v32 = vmul.f32 %v463_v21, %v463_v21  ;;  %v436_v39 = vld [vmem:[%s1385_s22 + $0x78] sm:$0xff] }
 0x218   : > { %v466_v36 = vsub.f32 %v434_v29, %v450_v30  ;;  %v480_v37 = vmul.f32 %v464_v26, %v464_v26  ;;  %v452_v40 = vld [vmem:[%s1391_s21 + $0x78] sm:$0xff]  ;;  %v467_v41 = vsub.f32 %v435_v34, %v451_v35  ;;  %v511_v61 = vand.u32 127, %v510_v60 }
 0x219   : > { %v488_v13 = vadd.f32 %v487_v8, %v473_v2  ;;  %v481_v42 = vmul.f32 %v465_v31, %v465_v31  ;;  %v468_v44 = vsub.f32 %v436_v39, %v452_v40  ;;  %v512_v63 = vld [vmem:[#allocation3] sm:$0x1] }
 0x21a   : > { %v482_v45 = vmul.f32 %v466_v36, %v466_v36  ;;  %v483_v47 = vmul.f32 %v467_v41, %v467_v41  ;;  %vm514_vm3 = vcmp.eq.s32.totalorder %v511_v61, %v513_v62 }
 0x21b   : > { %v489_v18 = vadd.f32 %v488_v13, %v474_v7  ;;  %v484_v49 = vmul.f32 %v468_v44, %v468_v44 }
 0x21d   : > { %v490_v23 = vadd.f32 %v489_v18, %v475_v12 }
 0x21f   : > { %v491_v28 = vadd.f32 %v490_v23, %v476_v17 }
 0x221   : > { %v492_v33 = vadd.f32 %v491_v28, %v477_v22 }
 0x223   : > { %v493_v38 = vadd.f32 %v492_v33, %v478_v27 }
 0x225   : > { %v494_v43 = vadd.f32 %v493_v38, %v479_v32 }
 0x227   : > { %v495_v46 = vadd.f32 %v494_v43, %v480_v37 }
 0x229   : > { %v496_v48 = vadd.f32 %v495_v46, %v481_v42 }
 0x22b   : > { %v497_v50 = vadd.f32 %v496_v48, %v482_v45 }
 0x22d   : > { %v498_v51 = vadd.f32 %v497_v50, %v483_v47 }
 0x22f   : > { %v499_v52 = vadd.f32 %v498_v51, %v484_v49 }
 0x231   : > { %500 = vadd.xlane.f32.xlu0 %v499_v52 }
 0x2be   : > { %v501_v53 = vpop.xlane.xlu0 %500 }
 0x2bf   : > { %v502_v54 = vrot.slane %v501_v53, 4 }
 0x2c1   : > { %v503_v55 = vadd.f32 %v502_v54, %v501_v53 }
 0x2c3   : > { %v504_v56 = vrot.slane %v503_v55, 2 }
 0x2c5   : > { %v505_v57 = vadd.f32 %v504_v56, %v503_v55 }
 0x2c7   : > { %v506_v58 = vrot.slane %v505_v57, 1 }
 0x2c9   : > { %v507_v59 = vadd.f32 %v506_v58, %v505_v57 }
 0x2cb   : > { %715 = vpush %v507_v59 }
 0x2fc   : > { %s716_s20 = spop %715 }
 0x2fd   : > { %v515_v0 = vstv %s716_s20 }
 0x2fe   : > { %v516_v1 = vsel %vm514_vm3, %v515_v0, 0.0 }
 0x2ff   : > { %v517_v2 = vadd.f32 %v516_v1, %v512_v63 }
 0x301   : > { %518 = vst [vmem:[#allocation3] sm:$0x1] %v517_v2 }
 0x302 PF: > { %p708_p4 = scmp.ne.s32.totalorder %s1127_s9, 2 }
 0x303   : > { %v523_v3 = vld [vmem:[#allocation2] sm:$0x1] (!%p708_p4)  ;;  %vm524_vm4 = vcmask (!%p708_p4), 253952   ;;  %vm544_vm7 = vcmask (!%p708_p4), 1040384  }
 0x304   : > { %522 = sbr.rel (%p708_p4) target bundleno = 1002 (0x3ea), region = 68  ;;  %v525_v5 = vsel (!%p708_p4), %vm524_vm4, %v523_v3, 0.0 }
 0x305   : > { %526 = vadd.xlane.f32.xlu0 (!%p708_p4), %v525_v5 }
 0x308   : > { %v536_v4 = vld [vmem:[#allocation3] sm:$0x1] (!%p708_p4) }
 0x309   : > { %820 = vrsqrt.f32 (!%p708_p4), %v536_v4  ;;  %vm539_vm5 = vcmp.eq.f32.partialorder (!%p708_p4), %v536_v4, inf  ;;  %v542_v7 = vand.u32 (!%p708_p4), 2147483648, %v536_v4  ;;  %vm541_vm6 = vcmp.eq.f32.partialorder (!%p708_p4), %v536_v4, 0.0 }
 0x313   : > { %v821_v6 = vpop.eup %820 }
 0x314   : > { %v538_v8 = vmul.f32 %v821_v6, %v536_v4 }
 0x316   : > { %v540_v9 = vsel %vm539_vm5, %v536_v4, %v538_v8 }
 0x317   : > { %v543_v10 = vsel %vm541_vm6, %v542_v7, %v540_v9 }
 0x318   : > { %v545_v11 = vsel %vm544_vm7, %v543_v10, 0.0 }
 0x319   : > { %546 = vadd.xlane.f32.xlu0 %v545_v11 }
 0x392   : > { %v527_v12 = vpop.xlane.xlu0 %526 }
 0x393   : > { %v528_v13 = vrot.slane %v527_v12, 4 }
 0x395   : > { %v529_v14 = vadd.f32 %v528_v13, %v527_v12 }
 0x397   : > { %v530_v15 = vrot.slane %v529_v14, 2 }
 0x399   : > { %v531_v16 = vadd.f32 %v530_v15, %v529_v14 }
 0x39b   : > { %v532_v17 = vrot.slane %v531_v16, 1 }
 0x39d   : > { %v533_v18 = vadd.f32 %v532_v17, %v531_v16 }
 0x39f   : > { %717 = vpush %v533_v18 }
 0x3a6   : > { %v547_v19 = vpop.xlane.xlu0 %546 }
 0x3a7   : > { %v548_v20 = vrot.slane %v547_v19, 4 }
 0x3a9   : > { %v549_v21 = vadd.f32 %v548_v20, %v547_v19 }
 0x3ab   : > { %v550_v22 = vrot.slane %v549_v21, 2 }
 0x3ad   : > { %v551_v23 = vadd.f32 %v550_v22, %v549_v21 }
 0x3af   : > { %v552_v24 = vrot.slane %v551_v23, 1 }
 0x3b1   : > { %v553_v25 = vadd.f32 %v552_v24, %v551_v23 }
 0x3b3   : > { %719 = vpush %v553_v25 }
 0x3d0   : > { %s718_s23 = spop %717 }
 0x3d1   : > { %s535_s12 = smul.f32 0.125, %s718_s23 }
 0x3e4   : > { %s720_s11 = spop %719 }
 0x3e5   : > { %s555_s19 = smul.f32 0.5, %s720_s11 }
 0x3e7   : > { %s556_s6 = sadd.f32 %s555_s19, %s535_s12 }
 0x3e9   : > { %558 = sst [smem:[#allocation14]] %s556_s6 }
 0x3ea PF: > { %p747_p6 = scmp.eq.s32.totalorder %s1127_s9, 2  ;;  %s952_s24 = scalar_lea.hbm %s1479_s5, 16 }
 0x3eb   : > { %p953_p9 = scmp.ne.s32.totalorder %s1479_s5, %s952_s24  ;;  %p958_p1 = scmp.lt.u32.totalorder %s952_s24, %s1479_s5 }
 0x3ed   : > { %p954_p0 = pnand %p953_p9, %p747_p6 }
 0x3ef   : > { %p955_p13 = pneg %p954_p0 }
 0x3f1   : > { %p960_p8 = pnand %p958_p1, %p955_p13 }
 0x3f3   : > { %963 = shalt.err (!%p960_p8)
}
 0x3f4   : > { %s1050_s25 = smov [#allocation14]  }
 0x3f5   : > { %730 = dma.smem_to_hbm (%p747_p6), %s1050_s25, 16, %s1479_s5, [#allocation8]  }
 0x3f6   : > { %1011 = dma.done.wait (%p747_p6), [#allocation8], 16  }
 0x3f7   : > { %1013 = vsyncadd (%p747_p6), [#allocation8], 4294967280 }
 0x3f8   : > { %572 = sfence }
 0x3f9 PF: > { %p26_p10 = scmp.ge.s32.totalorder %s1130_s10, 5   ;;  %s1499_s28 = smov %s1020_s29 }
 0x3fa   : > { %s1500_s29 = smov %s1024_s30  ;;  %s1501_s30 = smov %s1287_s8 }
 0x3fb   : > { %s1502_s6 = smov %s1032_s7  ;;  %s1503_s7 = smov %s1036_s0 }
 0x3fc   : > { %s1504_s0 = smov %s1157_s18  ;;  %s1505_s8 = smov %s1130_s10 }
 0x3fd   :  { %28 = sbr.rel (!%p26_p10) target bundleno = 23 (0x17), region = 127 }
 0x404   :  { %578 = vsyncpa [#allocation7], 1 }
 0x405   :  { %580 = vsyncpa [#allocation7 + $0x1], 1 }
 0x406   :  { %581 = vsyncpa [#allocation10], 1 }
 0x407   :  { %583 = vsyncpa [#allocation10 + $0x1], 1 }
 0x408   :  { %584 = vsyncpa [#allocation13], 1 }
 0x409   :  { %586 = vsyncpa [#allocation13 + $0x1], 1 }
 0x40a   :  { %587 = vsyncpa [#allocation8], 1 }
 0x40b   :  { %589 = vsyncpa [#allocation8 + $0x1], 1 }

</bundles_post_ra>
